<compile_context>
chip_gen: v7x
topology: tpu7x:2x2x1
jax: 0.10.0
libtpu: 0.0.40
codegen_flags: <defaults>
</compile_context>

<pallas_src>
import functools

import jax
import jax.numpy as jnp
from jax.experimental import pallas as pl
from jax.experimental.pallas import tpu as pltpu

NEG_INF = -1000000000.0          # exact PyTorch masked_fill value
PAD_FILL = 2.0 * NEG_INF         # padding rows sort strictly below masked rows
MASK_THRESH = 0.5 * NEG_INF      # separates valid codes from fill codes


def _recip(x, approx):
    return pl.reciprocal(x, approx=True) if approx else 1.0 / x


def _tile_logits_and_row_softmax(w_ref, ex, ex_bf, ey_bf, mxc, uyc, approx):
    """Shared tile prologue.

    ex: (TX, d) f32, ex_bf/ey_bf: bf16 tiles, mxc: (TX, 1) f32 x-row code
    (1=valid, NEG_INF=masked, PAD_FILL=pad), uyc: (1, len_y) f32 (Ey·w_y with
    masked columns pre-filled to NEG_INF).
    Returns (u, a_exp_bf16, inv_row_sum, a1_f32).
    """
    wx = w_ref[0:1, :]          # (1, d)
    wm = w_ref[1:2, :]          # (1, d)

    # U[i,j] = Ex[i]·w_x + Ey[j]·w_y + (Ex[i]*Ey[j])·w_m — main term is a
    # trans_b matmul over d, no explicit transpose.
    um = jnp.einsum("xd,yd->xy", (ex * wm).astype(jnp.bfloat16), ey_bf,
                    preferred_element_type=jnp.float32)          # (TX, len_y)
    ux = jnp.sum(ex * wx, axis=-1, keepdims=True)                # (TX, 1)
    u = um + ux + uyc

    # masked_fill(mask_x * mask_y == 0, -1e9), plus pad rows -> 2*NEG_INF.
    u = jnp.where(uyc > MASK_THRESH, u, NEG_INF)     # masked y columns
    u = jnp.where(mxc > 0.5, u, mxc)                 # masked / padded x rows

    # Row softmax over len_y — normalize AFTER the matmul (identical math,
    # (TX,d) multiply instead of (TX,len_y)).
    a_max = jnp.max(u, axis=-1, keepdims=True)
    a_exp = jnp.exp(u - a_max)
    inv_row = _recip(jnp.sum(a_exp, axis=-1, keepdims=True), approx)  # (TX,1)
    a_exp_bf = a_exp.astype(jnp.bfloat16)
    a1 = jnp.dot(a_exp_bf, ey_bf,
                 preferred_element_type=jnp.float32) * inv_row    # (TX, d)
    return u, a_exp_bf, inv_row, a1


def _gy_kernel(w_ref, ex_ref, ey_ref, mxc_ref, uyc_ref,
               gy_ref, b1_ref,
               m_sc, l_sc, accb1_sc, accb2_sc, *, approx):
    xi = pl.program_id(1)

    @pl.when(xi == 0)
    def _init():
        m_sc[...] = jnp.full_like(m_sc, -jnp.inf)
        l_sc[...] = jnp.zeros_like(l_sc)
        accb1_sc[...] = jnp.zeros_like(accb1_sc)
        accb2_sc[...] = jnp.zeros_like(accb2_sc)

    ex_raw = ex_ref[0]                       # (TX, d)    native dtype
    ey_raw = ey_ref[0]                       # (len_y, d) native dtype
    ex = ex_raw.astype(jnp.float32)
    ex_bf = ex_raw.astype(jnp.bfloat16)
    ey_bf = ey_raw.astype(jnp.bfloat16)
    mxc = mxc_ref[0]                         # (TX, 1)    f32 code
    uyc = uyc_ref[0]                         # (1, len_y) f32 code

    u, _, _, a1 = _tile_logits_and_row_softmax(
        w_ref, ex, ex_bf, ey_bf, mxc, uyc, approx)

    # Online (flash-style) softmax over len_x (column direction of U):
    #   B1[j] = (1/L_j) * sum_i exp(U[i,j]-M_j) * Ex[i]
    #   B2[j] = (1/L_j) * sum_i exp(U[i,j]-M_j) * A1[i]
    m_old = m_sc[...]                                            # (1, len_y)
    m_new = jnp.maximum(m_old, jnp.max(u, axis=0, keepdims=True))
    alpha = jnp.exp(m_old - m_new)
    p = jnp.exp(u - m_new)                                       # (TX, len_y)
    l_sc[...] = alpha * l_sc[...] + jnp.sum(p, axis=0, keepdims=True)
    m_sc[...] = m_new

    alpha_col = jnp.transpose(alpha)                             # (len_y, 1)
    p_bf = p.astype(jnp.bfloat16)
    # trans_a contractions (sum over the x-tile rows) feed the MXU directly.
    accb1_sc[...] = alpha_col * accb1_sc[...] + jnp.einsum(
        "xy,xd->yd", p_bf, ex_bf, preferred_element_type=jnp.float32)
    accb2_sc[...] = alpha_col * accb2_sc[...] + jnp.einsum(
        "xy,xd->yd", p_bf, a1.astype(jnp.bfloat16),
        preferred_element_type=jnp.float32)

    @pl.when(xi == pl.num_programs(1) - 1)
    def _finalize():
        d = accb1_sc.shape[-1]
        ey = ey_raw.astype(jnp.float32)
        inv_l = jnp.transpose(_recip(l_sc[...], approx))          # (len_y, 1)
        b1 = accb1_sc[...] * inv_l
        b2 = accb2_sc[...] * inv_l
        # Direct slab stores — no concatenate temporaries.
        gy_ref[0, :, 0:d] = ey.astype(gy_ref.dtype)
        gy_ref[0, :, d:2 * d] = b1.astype(gy_ref.dtype)
        gy_ref[0, :, 2 * d:3 * d] = b2.astype(gy_ref.dtype)
        gy_ref[0, :, 3 * d:4 * d] = (ey * b1).astype(gy_ref.dtype)
        gy_ref[0, :, 4 * d:5 * d] = (ey * b2).astype(gy_ref.dtype)
        b1_ref[0] = b1.astype(b1_ref.dtype)   # bf16 cross-pass intermediate


def _gx_kernel(w_ref, ex_ref, ey_ref, mxc_ref, uyc_ref, b1_ref, gx_ref, *,
               approx):
    ex_raw = ex_ref[0]
    ex = ex_raw.astype(jnp.float32)
    ex_bf = ex_raw.astype(jnp.bfloat16)
    ey_bf = ey_ref[0].astype(jnp.bfloat16)
    mxc = mxc_ref[0]
    uyc = uyc_ref[0]
    b1_bf = b1_ref[0]                        # (len_y, d) bf16 — used directly

    _, a_exp_bf, inv_row, a1 = _tile_logits_and_row_softmax(
        w_ref, ex, ex_bf, ey_bf, mxc, uyc, approx)
    a2 = jnp.dot(a_exp_bf, b1_bf,
                 preferred_element_type=jnp.float32) * inv_row   # (TX, d)

    d = ex.shape[-1]
    gx_ref[0, :, 0:d] = ex.astype(gx_ref.dtype)
    gx_ref[0, :, d:2 * d] = a1.astype(gx_ref.dtype)
    gx_ref[0, :, 2 * d:3 * d] = a2.astype(gx_ref.dtype)
    gx_ref[0, :, 3 * d:4 * d] = (ex * a1).astype(gx_ref.dtype)
    gx_ref[0, :, 4 * d:5 * d] = (ex * a2).astype(gx_ref.dtype)


def _vmem_capacity_bytes():
    try:
        return int(pltpu.get_tpu_info().vmem_capacity_bytes)
    except Exception:
        return 128 * 1024 * 1024


def _pass1_tile_bytes(tx, len_y, d, in_bytes, out_bytes):
    """Rough per-step VMEM footprint of pass 1 (the larger of the two passes)."""
    per_x = tx * (4 * len_y * 4            # u / p / exp temporaries (f32)
                  + 8 * d * 4              # ex, a1, slab temps
                  + 5 * d * out_bytes      # Gx-style slab (pass 2 reuses limit)
                  + 2 * d * in_bytes)      # double-buffered Ex block
    per_y = len_y * (2 * d * 4             # B1/B2 f32 accumulators
                     + 2 * d * in_bytes    # Ey block (double-buffered)
                     + 5 * d * out_bytes   # Gy output block
                     + 2 * d               # bf16 B1 output block
                     + 16)                 # running max/sum
    return per_x + per_y


def _pick_tile_x(len_x, len_y, d, in_bytes, out_bytes, capacity):
    """Pick the x-tile and the (possibly padded) len_x.

    Generation-aware: 256 only if it divides len_x AND leaves generous VMEM
    headroom (on v7x's 64 MiB this usually selects 128).  Non-aligned len_x is
    padded instead of falling back to a single huge tile.
    """
    if (len_x % 256 == 0 and
            2 * _pass1_tile_bytes(256, len_y, d, in_bytes, out_bytes)
            <= capacity // 3):
        return 256, len_x
    if len_x % 128 == 0:
        return 128, len_x
    if len_x <= 256:
        tx = -(-len_x // 8) * 8            # one 8-aligned tile (few pad rows)
        return tx, tx
    return 128, -(-len_x // 128) * 128     # pad long odd sequences to 128


def dual_attention(Ex, Ey, mask_x, mask_y, weight, *, dropout_rate=0.0,
                   out_dtype=None, approx_reciprocal=True):
    """Pallas TPU implementation of DualAttention.forward (3D branch).

    Args:
      Ex: [bs, len_x, d], Ey: [bs, len_y, d] (f32 or bf16, passed untouched)
      mask_x: [bs, len_x, 1] bool, mask_y: [bs, len_y, 1] bool
      weight: [1, 3*d] (similarity_linear.weight, rows = w_x|w_y|w_m)
      out_dtype: dtype for Gx/Gy.  Defaults to Ex.dtype; pass jnp.bfloat16 to
        halve the dominant HBM writeback (recommended unless the consumer
        needs f32 — biggest win on v5e's low HBM bandwidth).
      approx_reciprocal: use the EUP approximate reciprocal for the softmax
        normalizations (default); set False for exact 1/x.
    Returns:
      Gx: [bs, len_x, 5d], Gy: [bs, len_y, 5d]
    """
    # TODO(synk): dropout is identity at rate 0; kernel does not implement it.
    assert dropout_rate == 0.0, "dual_attention kernel only supports dropout_rate=0"

    bs, len_x, d = Ex.shape
    len_y = Ey.shape[1]
    out_dtype = Ex.dtype if out_dtype is None else jnp.dtype(out_dtype)
    in_bytes = jnp.dtype(Ex.dtype).itemsize
    out_bytes = jnp.dtype(out_dtype).itemsize

    capacity = _vmem_capacity_bytes()
    tx, lxp = _pick_tile_x(len_x, len_y, d, in_bytes, out_bytes, capacity)
    n_xt = lxp // tx
    pad = lxp - len_x

    # Similarity weights: rows of the (1, 3d) Linear weight are [w_x|w_y|w_m].
    w3 = weight.reshape(3, d).astype(jnp.float32)
    w2 = jnp.stack([w3[0], w3[2]])            # only w_x, w_m needed in-kernel

    # Hoisted loop-invariant term uy[j] = Ey[j]·w_y (was a per-tile f32 matmul
    # in the kernel), folded with mask_y into a single code array.
    uy = jnp.einsum("byd,d->by", Ey, w3[1].astype(Ey.dtype),
                    preferred_element_type=jnp.float32)
    uy_code = jnp.where(mask_y.reshape(bs, len_y), uy, NEG_INF)
    uy_code = uy_code.astype(jnp.float32).reshape(bs, 1, len_y)

    # x-row code: 1.0 valid, NEG_INF masked (exact reference fill), PAD_FILL
    # for padding rows (so pads contribute exactly zero to the column softmax).
    mx_code = jnp.where(mask_x.reshape(bs, len_x), 1.0, NEG_INF).astype(jnp.float32)
    ex_in = Ex
    if pad:
        mx_code = jnp.pad(mx_code, ((0, 0), (0, pad)), constant_values=PAD_FILL)
        ex_in = jnp.pad(Ex, ((0, 0), (0, pad), (0, 0)))
    mx_code = mx_code.reshape(bs, lxp, 1)

    vmem_limit = int(min(int(0.85 * capacity),
                         max(32 * 2 ** 20,
                             2 * _pass1_tile_bytes(tx, len_y, d,
                                                   in_bytes, out_bytes))))

    w_spec = pl.BlockSpec((2, d), lambda b, xi: (0, 0))
    ex_spec = pl.BlockSpec((1, tx, d), lambda b, xi: (b, xi, 0))
    ey_spec = pl.BlockSpec((1, len_y, d), lambda b, xi: (b, 0, 0))
    mx_spec = pl.BlockSpec((1, tx, 1), lambda b, xi: (b, xi, 0))
    uy_spec = pl.BlockSpec((1, 1, len_y), lambda b, xi: (b, 0, 0))
    b1_spec = pl.BlockSpec((1, len_y, d), lambda b, xi: (b, 0, 0))

    # ---- Pass 1: Gy branch (and bf16 B1, reused by pass 2). ----
    # TODO(synk): for v7x, single-buffer the xi-invariant Ey/Gy/B1 blocks
    # (pl.Buffered(1)) and add an inner len_y pipeline + a parallel len_y grid
    # axis for very long len_y / bs==1 megacore utilization.
    gy, b1 = pl.pallas_call(
        functools.partial(_gy_kernel, approx=approx_reciprocal),
        out_shape=(
            jax.ShapeDtypeStruct((bs, len_y, 5 * d), out_dtype),
            jax.ShapeDtypeStruct((bs, len_y, d), jnp.bfloat16),
        ),
        grid_spec=pltpu.PrefetchScalarGridSpec(
            num_scalar_prefetch=0,
            grid=(bs, n_xt),
            in_specs=[w_spec, ex_spec, ey_spec, mx_spec, uy_spec],
            out_specs=[
                pl.BlockSpec((1, len_y, 5 * d), lambda b, xi: (b, 0, 0)),
                b1_spec,
            ],
            scratch_shapes=[
                pltpu.VMEM((1, len_y), jnp.float32),      # running column max
                pltpu.VMEM((1, len_y), jnp.float32),      # running column sum
                pltpu.VMEM((len_y, d), jnp.float32),      # B1 accumulator
                pltpu.VMEM((len_y, d), jnp.float32),      # B2 accumulator
            ],
        ),
        compiler_params=pltpu.CompilerParams(
            dimension_semantics=("parallel", "arbitrary"),
            vmem_limit_bytes=vmem_limit),
    )(w2, ex_in, Ey, mx_code, uy_code)

    # ---- Pass 2: Gx branch (recomputes the cheap similarity tile). ----
    gx = pl.pallas_call(
        functools.partial(_gx_kernel, approx=approx_reciprocal),
        out_shape=jax.ShapeDtypeStruct((bs, lxp, 5 * d), out_dtype),
        grid_spec=pltpu.PrefetchScalarGridSpec(
            num_scalar_prefetch=0,
            grid=(bs, n_xt),
            in_specs=[w_spec, ex_spec, ey_spec, mx_spec, uy_spec, b1_spec],
            out_specs=pl.BlockSpec((1, tx, 5 * d), lambda b, xi: (b, xi, 0)),
        ),
        compiler_params=pltpu.CompilerParams(
            dimension_semantics=("parallel", "parallel"),
            vmem_limit_bytes=vmem_limit),
    )(w2, ex_in, Ey, mx_code, uy_code, b1)

    if pad:
        gx = gx[:, :len_x]
    return gx, gy


def _reference(Ex, Ey, mask_x, mask_y, weight):
    """Pure-JAX f32 reference matching the PyTorch forward (3D branch)."""
    d = Ex.shape[-1]
    wx, wy, wm = jnp.split(weight.reshape(3 * d), 3)
    u = (Ex @ wx)[:, :, None] + (Ey @ wy)[:, None, :] + jnp.einsum(
        "bxd,byd->bxy", Ex * wm, Ey)
    valid = (mask_x.astype(jnp.float32)[:, :, 0][:, :, None]
             * mask_y.astype(jnp.float32)[:, :, 0][:, None, :]) > 0
    u = jnp.where(valid, u, NEG_INF)
    A = jax.nn.softmax(u, axis=2)
    B = jnp.swapaxes(jax.nn.softmax(u, axis=1), -2, -1)
    A1 = A @ Ey
    B1 = B @ Ex
    A2 = A @ B1
    B2 = B @ A1
    Gx = jnp.concatenate([Ex, A1, A2, Ex * A1, Ex * A2], axis=-1)
    Gy = jnp.concatenate([Ey, B1, B2, Ey * B1, Ey * B2], axis=-1)
    return Gx, Gy


if __name__ == "__main__":
    bs, len_x, len_y, d_model = 2, 8, 8, 32

    key = jax.random.PRNGKey(0)
    k_ex, k_ey, k_w, k_ex2 = jax.random.split(key, 4)

    Ex = jax.random.normal(k_ex, (bs, len_x, d_model), dtype=jnp.float32)
    Ey = jax.random.normal(k_ey, (bs, len_y, d_model), dtype=jnp.float32)
    bound = 1.0 / jnp.sqrt(3.0 * d_model)
    weight = jax.random.uniform(k_w, (1, 3 * d_model),
                                minval=-bound, maxval=bound, dtype=jnp.float32)
    # Masks: most positions valid, a few tail positions masked out.
    mask_x = (jnp.arange(len_x)[None, :, None]
              < jnp.array([len_x, len_x - 2])[:, None, None])
    mask_y = (jnp.arange(len_y)[None, :, None]
              < jnp.array([len_y - 1, len_y])[:, None, None])

    Gx, Gy = dual_attention(Ex, Ey, mask_x, mask_y, weight)
    jax.block_until_ready((Gx, Gy))

    Gx_ref, Gy_ref = _reference(Ex, Ey, mask_x, mask_y, weight)
    assert Gx.shape == (bs, len_x, 5 * d_model)
    assert Gy.shape == (bs, len_y, 5 * d_model)
    # bf16 MXU operands (f32 accumulation) + approx reciprocal vs f32 reference.
    assert jnp.allclose(Gx, Gx_ref, rtol=5e-2, atol=5e-2)
    assert jnp.allclose(Gy, Gy_ref, rtol=5e-2, atol=5e-2)

    # Second check: non-8-aligned len_x exercises the pad-and-mask path.
    len_x2 = 13
    Ex2 = jax.random.normal(k_ex2, (bs, len_x2, d_model), dtype=jnp.float32)
    mask_x2 = (jnp.arange(len_x2)[None, :, None]
               < jnp.array([len_x2, len_x2 - 3])[:, None, None])
    Gx2, Gy2 = dual_attention(Ex2, Ey, mask_x2, mask_y, weight)
    jax.block_until_ready((Gx2, Gy2))
    Gx2_ref, Gy2_ref = _reference(Ex2, Ey, mask_x2, mask_y, weight)
    assert Gx2.shape == (bs, len_x2, 5 * d_model)
    assert Gy2.shape == (bs, len_y, 5 * d_model)
    assert jnp.allclose(Gx2, Gx2_ref, rtol=5e-2, atol=5e-2)
    assert jnp.allclose(Gy2, Gy2_ref, rtol=5e-2, atol=5e-2)

    print("KERNEL_OK")
</pallas_src>

<mosaic_0001>
module attributes {stable_mosaic.version = 11 : i64} {
  func.func @_gy_kernel(%arg0: i32, %arg1: i32, %arg2: memref<2x32xf32, #tpu.memory_space<vmem>>, %arg3: memref<1x8x32xf32, #tpu.memory_space<vmem>>, %arg4: memref<1x8x32xf32, #tpu.memory_space<vmem>>, %arg5: memref<1x8x1xf32, #tpu.memory_space<vmem>>, %arg6: memref<1x1x8xf32, #tpu.memory_space<vmem>>, %arg7: memref<1x8x160xf32, #tpu.memory_space<vmem>>, %arg8: memref<1x8x32xbf16, #tpu.memory_space<vmem>>, %arg9: memref<1x8xf32, #tpu.memory_space<vmem>>, %arg10: memref<1x8xf32, #tpu.memory_space<vmem>>, %arg11: memref<8x32xf32, #tpu.memory_space<vmem>>, %arg12: memref<8x32xf32, #tpu.memory_space<vmem>>) attributes {dimension_semantics = [#tpu.dimension_semantics<parallel>, #tpu.dimension_semantics<arbitrary>], iteration_bounds = array<i64: 2, 1>, scalar_prefetch = 0 : i64, scratch_operands = 4 : i64, tpu.core_type = #tpu.core_type<tc>, window_params = [{pipeline_mode = #tpu.pipeline_mode<synchronous>, transform_indices = @transform_0, window_bounds = array<i64: 2, 32>}, {transform_indices = @transform_1, window_bounds = array<i64: 1, 8, 32>}, {transform_indices = @transform_2, window_bounds = array<i64: 1, 8, 32>}, {transform_indices = @transform_3, window_bounds = array<i64: 1, 8, 1>}, {transform_indices = @transform_4, window_bounds = array<i64: 1, 1, 8>}, {transform_indices = @transform_5, window_bounds = array<i64: 1, 8, 160>}, {transform_indices = @transform_6, window_bounds = array<i64: 1, 8, 32>}]} {
    %c0_i32 = arith.constant 0 : i32
    %0 = arith.cmpi eq, %arg1, %c0_i32 : i32
    %1 = arith.extui %0 : i1 to i32
    %c0_i32_0 = arith.constant 0 : i32
    %2 = arith.cmpi ne, %1, %c0_i32_0 : i32
    scf.if %2 {
      %cst_44 = arith.constant 0xFF800000 : f32
      %86 = vector.broadcast %cst_44 : f32 to vector<1x8xf32>
      %c0_45 = arith.constant 0 : index
      %c0_46 = arith.constant 0 : index
      %87 = vector.load %arg9[%c0_45, %c0_46] : memref<1x8xf32, #tpu.memory_space<vmem>>, vector<1x8xf32>
      tpu.vector_store %arg9[%c0_45, %c0_46], %86 {strides = array<i32>} : memref<1x8xf32, #tpu.memory_space<vmem>>, vector<1x8xf32>,
      %cst_47 = arith.constant 0.000000e+00 : f32
      %88 = vector.broadcast %cst_47 : f32 to vector<1x8xf32>
      %c0_48 = arith.constant 0 : index
      %c0_49 = arith.constant 0 : index
      %89 = vector.load %arg10[%c0_48, %c0_49] : memref<1x8xf32, #tpu.memory_space<vmem>>, vector<1x8xf32>
      tpu.vector_store %arg10[%c0_48, %c0_49], %88 {strides = array<i32>} : memref<1x8xf32, #tpu.memory_space<vmem>>, vector<1x8xf32>,
      %cst_50 = arith.constant 0.000000e+00 : f32
      %90 = vector.broadcast %cst_50 : f32 to vector<8x32xf32>
      %c0_51 = arith.constant 0 : index
      %c0_52 = arith.constant 0 : index
      %91 = vector.load %arg11[%c0_51, %c0_52] : memref<8x32xf32, #tpu.memory_space<vmem>>, vector<8x32xf32>
      tpu.vector_store %arg11[%c0_51, %c0_52], %90 {strides = array<i32>} : memref<8x32xf32, #tpu.memory_space<vmem>>, vector<8x32xf32>,
      %cst_53 = arith.constant 0.000000e+00 : f32
      %92 = vector.broadcast %cst_53 : f32 to vector<8x32xf32>
      %c0_54 = arith.constant 0 : index
      %c0_55 = arith.constant 0 : index
      %93 = vector.load %arg12[%c0_54, %c0_55] : memref<8x32xf32, #tpu.memory_space<vmem>>, vector<8x32xf32>
      tpu.vector_store %arg12[%c0_54, %c0_55], %92 {strides = array<i32>} : memref<8x32xf32, #tpu.memory_space<vmem>>, vector<8x32xf32>,
    } else {
    }
    %c0 = arith.constant 0 : index
    %c0_1 = arith.constant 0 : index
    %c0_2 = arith.constant 0 : index
    %3 = vector.load %arg3[%c0, %c0_1, %c0_2] : memref<1x8x32xf32, #tpu.memory_space<vmem>>, vector<1x8x32xf32>
    %4 = vector.shape_cast %3 : vector<1x8x32xf32> to vector<8x32xf32>
    %c0_3 = arith.constant 0 : index
    %c0_4 = arith.constant 0 : index
    %c0_5 = arith.constant 0 : index
    %5 = vector.load %arg4[%c0_3, %c0_4, %c0_5] : memref<1x8x32xf32, #tpu.memory_space<vmem>>, vector<1x8x32xf32>
    %6 = vector.shape_cast %5 : vector<1x8x32xf32> to vector<8x32xf32>
    %7 = arith.truncf %4 : vector<8x32xf32> to vector<8x32xbf16>
    %8 = arith.truncf %6 : vector<8x32xf32> to vector<8x32xbf16>
    %c0_6 = arith.constant 0 : index
    %c0_7 = arith.constant 0 : index
    %c0_8 = arith.constant 0 : index
    %9 = vector.load %arg5[%c0_6, %c0_7, %c0_8] : memref<1x8x1xf32, #tpu.memory_space<vmem>>, vector<1x8x1xf32>
    %10 = vector.shape_cast %9 : vector<1x8x1xf32> to vector<8x1xf32>
    %c0_9 = arith.constant 0 : index
    %c0_10 = arith.constant 0 : index
    %c0_11 = arith.constant 0 : index
    %11 = vector.load %arg6[%c0_9, %c0_10, %c0_11] : memref<1x1x8xf32, #tpu.memory_space<vmem>>, vector<1x1x8xf32>
    %12 = vector.shape_cast %11 : vector<1x1x8xf32> to vector<1x8xf32>
    %c0_12 = arith.constant 0 : index
    %c0_13 = arith.constant 0 : index
    %13 = vector.load %arg2[%c0_12, %c0_13] : memref<2x32xf32, #tpu.memory_space<vmem>>, vector<1x32xf32>
    %c1 = arith.constant 1 : index
    %c0_14 = arith.constant 0 : index
    %14 = vector.load %arg2[%c1, %c0_14] : memref<2x32xf32, #tpu.memory_space<vmem>>, vector<1x32xf32>
    %15 = vector.broadcast %14 : vector<1x32xf32> to vector<8x32xf32>
    %16 = arith.mulf %4, %15 : vector<8x32xf32>
    %17 = arith.truncf %16 : vector<8x32xf32> to vector<8x32xbf16>
    "tpu.trace_start"() <{level = 10 : i32, message = "xd,yd->xy"}> : () -> ()
    %cst = arith.constant dense<0.000000e+00> : vector<8x8xf32>
    %18 = tpu.matmul %17, %8, %cst {dimension_numbers = #tpu.dot_dimension_numbers<[1], [1], [0], [0], [0, 0, 1, 0], [], []>} : vector<8x32xbf16>, vector<8x32xbf16>, vector<8x8xf32> -> vector<8x8xf32>
    "tpu.trace_stop"() : () -> ()
    %19 = vector.broadcast %13 : vector<1x32xf32> to vector<8x32xf32>
    %20 = arith.mulf %4, %19 : vector<8x32xf32>
    %cst_15 = arith.constant dense<0.000000e+00> : vector<8xf32>
    %21 = vector.multi_reduction <add>, %20, %cst_15 [1] : vector<8x32xf32> to vector<8xf32>
    %22 = vector.shape_cast %21 : vector<8xf32> to vector<8x1xf32>
    %23 = vector.broadcast %22 : vector<8x1xf32> to vector<8x8xf32>
    %24 = arith.addf %18, %23 : vector<8x8xf32>
    %25 = vector.broadcast %12 : vector<1x8xf32> to vector<8x8xf32>
    %26 = arith.addf %24, %25 : vector<8x8xf32>
    %cst_16 = arith.constant -5.000000e+08 : f32
    %27 = vector.broadcast %cst_16 : f32 to vector<1x8xf32>
    %28 = arith.cmpf ogt, %12, %27 : vector<1x8xf32>
    %cst_17 = arith.constant -1.000000e+09 : f32
    %29 = vector.shape_cast %28 : vector<1x8xi1> to vector<1x8xi1>
    %30 = vector.broadcast %29 : vector<1x8xi1> to vector<8x8xi1>
    %31 = vector.broadcast %cst_17 : f32 to vector<8x8xf32>
    %32 = arith.select %30, %26, %31 : vector<8x8xi1>, vector<8x8xf32>
    %cst_18 = arith.constant 5.000000e-01 : f32
    %33 = vector.broadcast %cst_18 : f32 to vector<8x1xf32>
    %34 = arith.cmpf ogt, %10, %33 : vector<8x1xf32>
    %35 = vector.shape_cast %34 : vector<8x1xi1> to vector<8x1xi1>
    %36 = vector.broadcast %35 : vector<8x1xi1> to vector<8x8xi1>
    %37 = vector.shape_cast %10 : vector<8x1xf32> to vector<8x1xf32>
    %38 = vector.broadcast %37 : vector<8x1xf32> to vector<8x8xf32>
    %39 = arith.select %36, %32, %38 : vector<8x8xi1>, vector<8x8xf32>
    %cst_19 = arith.constant dense<0xFF800000> : vector<8xf32>
    %40 = vector.multi_reduction <maximumf>, %39, %cst_19 [1] : vector<8x8xf32> to vector<8xf32>
    %41 = vector.shape_cast %40 : vector<8xf32> to vector<8x1xf32>
    %42 = vector.broadcast %41 : vector<8x1xf32> to vector<8x8xf32>
    %43 = arith.subf %39, %42 : vector<8x8xf32>
    %44 = math.exp %43 : vector<8x8xf32>
    %cst_20 = arith.constant dense<0.000000e+00> : vector<8xf32>
    %45 = vector.multi_reduction <add>, %44, %cst_20 [1] : vector<8x8xf32> to vector<8xf32>
    %46 = vector.shape_cast %45 : vector<8xf32> to vector<8x1xf32>
    %47 = tpu.reciprocal %46 {approx = true} : vector<8x1xf32> -> vector<8x1xf32>
    %48 = arith.truncf %44 : vector<8x8xf32> to vector<8x8xbf16>
    %cst_21 = arith.constant dense<0.000000e+00> : vector<8x32xf32>
    %49 = tpu.matmul %48, %8, %cst_21 {dimension_numbers = #tpu.dot_dimension_numbers<[1], [0], [0], [1], [0, 0, 1, 1], [], []>} : vector<8x8xbf16>, vector<8x32xbf16>, vector<8x32xf32> -> vector<8x32xf32>
    %50 = vector.broadcast %47 : vector<8x1xf32> to vector<8x32xf32>
    %51 = arith.mulf %49, %50 : vector<8x32xf32>
    %c0_22 = arith.constant 0 : index
    %c0_23 = arith.constant 0 : index
    %52 = vector.load %arg9[%c0_22, %c0_23] : memref<1x8xf32, #tpu.memory_space<vmem>>, vector<1x8xf32>
    %cst_24 = arith.constant dense<0xFF800000> : vector<8xf32>
    %53 = vector.multi_reduction <maximumf>, %39, %cst_24 [0] : vector<8x8xf32> to vector<8xf32>
    %54 = vector.shape_cast %53 : vector<8xf32> to vector<1x8xf32>
    %55 = arith.maximumf %52, %54 : vector<1x8xf32>
    %56 = arith.subf %52, %55 : vector<1x8xf32>
    %57 = math.exp %56 : vector<1x8xf32>
    %58 = vector.broadcast %55 : vector<1x8xf32> to vector<8x8xf32>
    %59 = arith.subf %39, %58 : vector<8x8xf32>
    %60 = math.exp %59 : vector<8x8xf32>
    %c0_25 = arith.constant 0 : index
    %c0_26 = arith.constant 0 : index
    %61 = vector.load %arg10[%c0_25, %c0_26] : memref<1x8xf32, #tpu.memory_space<vmem>>, vector<1x8xf32>
    %62 = arith.mulf %57, %61 : vector<1x8xf32>
    %cst_27 = arith.constant dense<0.000000e+00> : vector<8xf32>
    %63 = vector.multi_reduction <add>, %60, %cst_27 [0] : vector<8x8xf32> to vector<8xf32>
    %64 = vector.shape_cast %63 : vector<8xf32> to vector<1x8xf32>
    %65 = arith.addf %62, %64 : vector<1x8xf32>
    %c0_28 = arith.constant 0 : index
    %c0_29 = arith.constant 0 : index
    %66 = vector.load %arg10[%c0_28, %c0_29] : memref<1x8xf32, #tpu.memory_space<vmem>>, vector<1x8xf32>
    tpu.vector_store %arg10[%c0_28, %c0_29], %65 {strides = array<i32>} : memref<1x8xf32, #tpu.memory_space<vmem>>, vector<1x8xf32>,
    %c0_30 = arith.constant 0 : index
    %c0_31 = arith.constant 0 : index
    %67 = vector.load %arg9[%c0_30, %c0_31] : memref<1x8xf32, #tpu.memory_space<vmem>>, vector<1x8xf32>
    tpu.vector_store %arg9[%c0_30, %c0_31], %55 {strides = array<i32>} : memref<1x8xf32, #tpu.memory_space<vmem>>, vector<1x8xf32>,
    %68 = tpu.transpose %57, [1, 0] : vector<1x8xf32> -> vector<8x1xf32>
    %69 = arith.truncf %60 : vector<8x8xf32> to vector<8x8xbf16>
    %c0_32 = arith.constant 0 : index
    %c0_33 = arith.constant 0 : index
    %70 = vector.load %arg11[%c0_32, %c0_33] : memref<8x32xf32, #tpu.memory_space<vmem>>, vector<8x32xf32>
    %71 = vector.broadcast %68 : vector<8x1xf32> to vector<8x32xf32>
    %72 = arith.mulf %71, %70 : vector<8x32xf32>
    "tpu.trace_start"() <{level = 10 : i32, message = "xy,xd->yd"}> : () -> ()
    %cst_34 = arith.constant dense<0.000000e+00> : vector<8x32xf32>
    %73 = tpu.matmul %69, %7, %cst_34 {dimension_numbers = #tpu.dot_dimension_numbers<[0], [0], [1], [1], [0, 1, 1, 1], [], []>} : vector<8x8xbf16>, vector<8x32xbf16>, vector<8x32xf32> -> vector<8x32xf32>
    "tpu.trace_stop"() : () -> ()
    %74 = arith.addf %72, %73 : vector<8x32xf32>
    %c0_35 = arith.constant 0 : index
    %c0_36 = arith.constant 0 : index
    %75 = vector.load %arg11[%c0_35, %c0_36] : memref<8x32xf32, #tpu.memory_space<vmem>>, vector<8x32xf32>
    tpu.vector_store %arg11[%c0_35, %c0_36], %74 {strides = array<i32>} : memref<8x32xf32, #tpu.memory_space<vmem>>, vector<8x32xf32>,
    %c0_37 = arith.constant 0 : index
    %c0_38 = arith.constant 0 : index
    %76 = vector.load %arg12[%c0_37, %c0_38] : memref<8x32xf32, #tpu.memory_space<vmem>>, vector<8x32xf32>
    %77 = vector.broadcast %68 : vector<8x1xf32> to vector<8x32xf32>
    %78 = arith.mulf %77, %76 : vector<8x32xf32>
    %79 = arith.truncf %51 : vector<8x32xf32> to vector<8x32xbf16>
    "tpu.trace_start"() <{level = 10 : i32, message = "xy,xd->yd"}> : () -> ()
    %cst_39 = arith.constant dense<0.000000e+00> : vector<8x32xf32>
    %80 = tpu.matmul %69, %79, %cst_39 {dimension_numbers = #tpu.dot_dimension_numbers<[0], [0], [1], [1], [0, 1, 1, 1], [], []>} : vector<8x8xbf16>, vector<8x32xbf16>, vector<8x32xf32> -> vector<8x32xf32>
    "tpu.trace_stop"() : () -> ()
    %81 = arith.addf %78, %80 : vector<8x32xf32>
    %c0_40 = arith.constant 0 : index
    %c0_41 = arith.constant 0 : index
    %82 = vector.load %arg12[%c0_40, %c0_41] : memref<8x32xf32, #tpu.memory_space<vmem>>, vector<8x32xf32>
    tpu.vector_store %arg12[%c0_40, %c0_41], %81 {strides = array<i32>} : memref<8x32xf32, #tpu.memory_space<vmem>>, vector<8x32xf32>,
    %c0_i32_42 = arith.constant 0 : i32
    %83 = arith.cmpi eq, %arg1, %c0_i32_42 : i32
    %84 = arith.extui %83 : i1 to i32
    %c0_i32_43 = arith.constant 0 : i32
    %85 = arith.cmpi ne, %84, %c0_i32_43 : i32
    scf.if %85 {
      %c0_44 = arith.constant 0 : index
      %c0_45 = arith.constant 0 : index
      %86 = vector.load %arg10[%c0_44, %c0_45] : memref<1x8xf32, #tpu.memory_space<vmem>>, vector<1x8xf32>
      %87 = tpu.reciprocal %86 {approx = true} : vector<1x8xf32> -> vector<1x8xf32>
      %88 = tpu.transpose %87, [1, 0] : vector<1x8xf32> -> vector<8x1xf32>
      %c0_46 = arith.constant 0 : index
      %c0_47 = arith.constant 0 : index
      %89 = vector.load %arg11[%c0_46, %c0_47] : memref<8x32xf32, #tpu.memory_space<vmem>>, vector<8x32xf32>
      %90 = vector.broadcast %88 : vector<8x1xf32> to vector<8x32xf32>
      %91 = arith.mulf %89, %90 : vector<8x32xf32>
      %c0_48 = arith.constant 0 : index
      %c0_49 = arith.constant 0 : index
      %92 = vector.load %arg12[%c0_48, %c0_49] : memref<8x32xf32, #tpu.memory_space<vmem>>, vector<8x32xf32>
      %93 = vector.broadcast %88 : vector<8x1xf32> to vector<8x32xf32>
      %94 = arith.mulf %92, %93 : vector<8x32xf32>
      %c0_50 = arith.constant 0 : index
      %c0_51 = arith.constant 0 : index
      %c0_52 = arith.constant 0 : index
      %95 = vector.load %arg7[%c0_50, %c0_51, %c0_52] : memref<1x8x160xf32, #tpu.memory_space<vmem>>, vector<1x8x32xf32>
      %96 = vector.shape_cast %95 : vector<1x8x32xf32> to vector<8x32xf32>
      %97 = vector.shape_cast %6 : vector<8x32xf32> to vector<1x8x32xf32>
      tpu.vector_store %arg7[%c0_50, %c0_51, %c0_52], %97 {strides = array<i32>} : memref<1x8x160xf32, #tpu.memory_space<vmem>>, vector<1x8x32xf32>,
      %c0_53 = arith.constant 0 : index
      %c0_54 = arith.constant 0 : index
      %c32 = arith.constant 32 : index
      %98 = vector.load %arg7[%c0_53, %c0_54, %c32] : memref<1x8x160xf32, #tpu.memory_space<vmem>>, vector<1x8x32xf32>
      %99 = vector.shape_cast %98 : vector<1x8x32xf32> to vector<8x32xf32>
      %100 = vector.shape_cast %91 : vector<8x32xf32> to vector<1x8x32xf32>
      tpu.vector_store %arg7[%c0_53, %c0_54, %c32], %100 {strides = array<i32>} : memref<1x8x160xf32, #tpu.memory_space<vmem>>, vector<1x8x32xf32>,
      %c0_55 = arith.constant 0 : index
      %c0_56 = arith.constant 0 : index
      %c64 = arith.constant 64 : index
      %101 = vector.load %arg7[%c0_55, %c0_56, %c64] : memref<1x8x160xf32, #tpu.memory_space<vmem>>, vector<1x8x32xf32>
      %102 = vector.shape_cast %101 : vector<1x8x32xf32> to vector<8x32xf32>
      %103 = vector.shape_cast %94 : vector<8x32xf32> to vector<1x8x32xf32>
      tpu.vector_store %arg7[%c0_55, %c0_56, %c64], %103 {strides = array<i32>} : memref<1x8x160xf32, #tpu.memory_space<vmem>>, vector<1x8x32xf32>,
      %104 = arith.mulf %6, %91 : vector<8x32xf32>
      %c0_57 = arith.constant 0 : index
      %c0_58 = arith.constant 0 : index
      %c96 = arith.constant 96 : index
      %105 = vector.load %arg7[%c0_57, %c0_58, %c96] : memref<1x8x160xf32, #tpu.memory_space<vmem>>, vector<1x8x32xf32>
      %106 = vector.shape_cast %105 : vector<1x8x32xf32> to vector<8x32xf32>
      %107 = vector.shape_cast %104 : vector<8x32xf32> to vector<1x8x32xf32>
      tpu.vector_store %arg7[%c0_57, %c0_58, %c96], %107 {strides = array<i32>} : memref<1x8x160xf32, #tpu.memory_space<vmem>>, vector<1x8x32xf32>,
      %108 = arith.mulf %6, %94 : vector<8x32xf32>
      %c0_59 = arith.constant 0 : index
      %c0_60 = arith.constant 0 : index
      %c128 = arith.constant 128 : index
      %109 = vector.load %arg7[%c0_59, %c0_60, %c128] : memref<1x8x160xf32, #tpu.memory_space<vmem>>, vector<1x8x32xf32>
      %110 = vector.shape_cast %109 : vector<1x8x32xf32> to vector<8x32xf32>
      %111 = vector.shape_cast %108 : vector<8x32xf32> to vector<1x8x32xf32>
      tpu.vector_store %arg7[%c0_59, %c0_60, %c128], %111 {strides = array<i32>} : memref<1x8x160xf32, #tpu.memory_space<vmem>>, vector<1x8x32xf32>,
      %112 = arith.truncf %91 : vector<8x32xf32> to vector<8x32xbf16>
      %c0_61 = arith.constant 0 : index
      %c0_62 = arith.constant 0 : index
      %c0_63 = arith.constant 0 : index
      %113 = vector.load %arg8[%c0_61, %c0_62, %c0_63] : memref<1x8x32xbf16, #tpu.memory_space<vmem>>, vector<1x8x32xbf16>
      %114 = vector.shape_cast %113 : vector<1x8x32xbf16> to vector<8x32xbf16>
      %115 = vector.shape_cast %112 : vector<8x32xbf16> to vector<1x8x32xbf16>
      tpu.vector_store %arg8[%c0_61, %c0_62, %c0_63], %115 {strides = array<i32>} : memref<1x8x32xbf16, #tpu.memory_space<vmem>>, vector<1x8x32xbf16>,
    } else {
    }
    return
  }
  func.func @transform_0(%arg0: i32, %arg1: i32) -> (i32, i32) {
    %c0_i32 = arith.constant 0 : i32
    %c0_i32_0 = arith.constant 0 : i32
    %c0_i32_1 = arith.constant 0 : i32
    return %c0_i32, %c0_i32_0 : i32, i32
  }
  func.func @transform_1(%arg0: i32, %arg1: i32) -> (i32, i32, i32) {
    %c0_i32 = arith.constant 0 : i32
    %c0_i32_0 = arith.constant 0 : i32
    return %arg0, %arg1, %c0_i32 : i32, i32, i32
  }
  func.func @transform_2(%arg0: i32, %arg1: i32) -> (i32, i32, i32) {
    %c0_i32 = arith.constant 0 : i32
    %c0_i32_0 = arith.constant 0 : i32
    %c0_i32_1 = arith.constant 0 : i32
    return %arg0, %c0_i32, %c0_i32_0 : i32, i32, i32
  }
  func.func @transform_3(%arg0: i32, %arg1: i32) -> (i32, i32, i32) {
    %c0_i32 = arith.constant 0 : i32
    %c0_i32_0 = arith.constant 0 : i32
    return %arg0, %arg1, %c0_i32 : i32, i32, i32
  }
  func.func @transform_4(%arg0: i32, %arg1: i32) -> (i32, i32, i32) {
    %c0_i32 = arith.constant 0 : i32
    %c0_i32_0 = arith.constant 0 : i32
    %c0_i32_1 = arith.constant 0 : i32
    return %arg0, %c0_i32, %c0_i32_0 : i32, i32, i32
  }
  func.func @transform_5(%arg0: i32, %arg1: i32) -> (i32, i32, i32) {
    %c0_i32 = arith.constant 0 : i32
    %c0_i32_0 = arith.constant 0 : i32
    %c0_i32_1 = arith.constant 0 : i32
    return %arg0, %c0_i32, %c0_i32_0 : i32, i32, i32
  }
  func.func @transform_6(%arg0: i32, %arg1: i32) -> (i32, i32, i32) {
    %c0_i32 = arith.constant 0 : i32
    %c0_i32_0 = arith.constant 0 : i32
    %c0_i32_1 = arith.constant 0 : i32
    return %arg0, %c0_i32, %c0_i32_0 : i32, i32, i32
  }
}

</mosaic_0001>

<bundles_post_ra>
// kernel: tpu_custom_call.1
= control target key start
LH: loop header
LB: loop body
LE: loop exit
PB: predicated region body
PF: predicated region fallthrough
CT: control target
= control target key end

     0   :  { %12 = vsyncpa [#allocation7], 0  ;;  %s1580_s0 = inlined_call_operand.vmem [shape: f32[2,32], index: 0, kind: input, shape index: {}]   ;;  %s1581_s1 = inlined_call_operand.vmem [shape: f32[2,8,32], index: 1, kind: input, shape index: {}]   ;;  %s1582_s2 = inlined_call_operand.hbm [shape: f32[2,8,32], index: 2, kind: input, shape index: {}]   ;;  %s1583_s3 = inlined_call_operand.vmem [shape: f32[2,8,1], index: 3, kind: input, shape index: {}]   ;;  %s1584_s4 = inlined_call_operand.vmem [shape: f32[2,1,8], index: 4, kind: input, shape index: {}]   ;;  %s1585_s5 = inlined_call_operand.hbm [shape: f32[2,8,160], index: 5, kind: output, shape index: {0}]   ;;  %s1586_s6 = inlined_call_operand.hbm [shape: bf16[2,8,32], index: 6, kind: output, shape index: {1}]  }
   0x1   :  { %14 = vsyncpa [#allocation7 + $0x1], 0 }
   0x2   :  { %15 = vsyncpa [#allocation8], 0 }
   0x3   :  { %17 = vsyncpa [#allocation8 + $0x1], 0 }
   0x4   :  { %18 = vsyncpa [#allocation11], 0 }
   0x5   :  { %20 = vsyncpa [#allocation11 + $0x1], 0  ;;  %s1299_s21 = smov 0   ;;  %s1301_s22 = smov 0  }
   0x6   :  { %s1303_s23 = smov 0   ;;  %s1305_s24 = smov 0  }
   0x7   :  { %s1307_s25 = smov 0   ;;  %s1309_s26 = smov 0  }
   0x8 LB: > { %s964_s27 = sadd.s32 4294967295, %s1252_s26   ;;  %s965_s28 = sadd.s32 4294967294, %s1252_s26   ;;  %s1252_s26 = sphi %s1309_s26, %s26_s26   ;;  %s1248_s25 = sphi %s1307_s25, %s1602_s25   ;;  %s1244_s24 = sphi %s1305_s24, %s1601_s24   ;;  %s1240_s23 = sphi %s1303_s23, %s1600_s23   ;;  %s1236_s22 = sphi %s1301_s22, %s1599_s22   ;;  %s1232_s21 = sphi %s1299_s21, %s1598_s21  }
   0x9   : > { %s38_s29 = sadd.s32 1, %s1248_s25  ;;  %s94_s30 = sadd.s32 1, %s1240_s23 }
   0xa   : > { %p40_p0 = scmp.ge.s32.totalorder %s38_s29, 2  ;;  %p101_p1 = scmp.ne.s32.totalorder %s1240_s23, %s1236_s22 }
   0xb   : > { %p102_p2 = scmp.eq.s32.totalorder %s1252_s26, 0  ;;  %p107_p3 = scmp.ne.s32.totalorder %s1236_s22, %s1232_s21 }
   0xc   : > { %s1604_s29 = smov (%p40_p0, %s38_s29), 0  ;;  %p108_p5 = scmp.eq.s32.totalorder %s964_s27, 0 }
   0xd   : > { %p1340_p4 = por %p102_p2, %p101_p1  ;;  %s91_s8 = ssub.s32 %s1248_s25, %s1604_s29 }
   0xe   : > { %p185_p6 = scmp.eq.s32.totalorder %s964_s27, 1  ;;  %p92_p7 = scmp.eq.s32.totalorder %s91_s8, 0 }
   0xf   : > { %p1346_p8 = por %p108_p5, %p107_p3  ;;  %p191_p10 = scmp.eq.s32.totalorder %s965_s28, 1 }
  0x10   : > { %p1350_p9 = por %p185_p6, %p101_p1  ;;  %p1039_p13 = scmp.lt.s32.totalorder %s1252_s26, 2 }
  0x11   : > { %s1355_s11 = scalar_select %p92_p7, %s1240_s23, %s94_s30  }
  0x12   : > { %s1590_s10 = scalar_select %p1350_p9, 1, 0 }
  0x13   : > { %p1357_p11 = por %p191_p10, %p107_p3  ;;  %s250_s13 = sand.u32 1, %s1240_s23  }
  0x14   : > { %s968_s14 = sshll.u32 %s250_s13, 3  ;;  %s969_s15 = sshll.u32 %s1248_s25, 7 }
  0x15   : > { %s1591_s12 = scalar_select %p1357_p11, 1, 0 }
  0x16   : > { %s1368_s18 = scalar_lea.hbm %s1582_s2, %s969_s15  ;;  %s254_s19 = scalar_lea.vmem [#allocation6], %s968_s14 }
  0x17   : > { %s261_s20 = sshll.u32 %s254_s19, 4  ;;  %p1374_p0 = pnand %p1039_p13, %p1340_p4  ;;  %s1370_s20 = int_to_ptr.vmem [resolvable:$true] %s261_s20 }
  0x18   : > { %s251_s28 = scalar_lea.sflag [#allocation7], %s250_s13  ;;  %s1108_s30 = scalar_lea.hbm %s1368_s18, 128 }
  0x19   : > { %p1109_p3 = scmp.ne.s32.totalorder %s1368_s18, %s1108_s30  ;;  %p1110_p5 = pneg %p1374_p0 }
  0x1a   : > { %s1113_s7 = scalar_lea.hbm %s1582_s2, 256  ;;  %p1114_p4 = scmp.lt.u32.totalorder %s1368_s18, %s1582_s2 }
  0x1b   : > { %p1111_p6 = pnand %p1110_p5, %p1109_p3  ;;  %p1115_p10 = scmp.lt.u32.totalorder %s1113_s7, %s1108_s30 }
  0x1c   : > { %p1117_p12 = scmp.lt.u32.totalorder %s1108_s30, %s1368_s18 }
  0x1d   : > { %p1112_p7 = pneg %p1111_p6  ;;  %p1116_p13 = por %p1115_p10, %p1114_p4 }
  0x1f   : > { %p1118_p1 = por %p1117_p12, %p1116_p13 }
  0x21   : > { %p1119_p2 = pnand %p1118_p1, %p1112_p7 }
  0x23   : > { %1122 = shalt.err (!%p1119_p2)
}
  0x24   : > { %s1123_s13 = scalar_lea.vmem %s1370_s20, 128  ;;  %s1254_s17 = smov [#allocation6]  }
  0x25   : > { %p1124_p3 = scmp.ne.s32.totalorder %s1370_s20, %s1123_s13  ;;  %s1128_s19 = sshll.u32 %s1254_s17, 4  ;;  %s1129_s19 = int_to_ptr.vmem [resolvable:$false] %s1128_s19 }
  0x26   : > { %s1130_s8 = scalar_lea.vmem %s1129_s19, 256  ;;  %p1131_p9 = scmp.lt.s32.totalorder %s1370_s20, %s1129_s19 }
  0x27   : > { %p1126_p6 = pnand %p1124_p3, %p1110_p5  ;;  %p1132_p4 = scmp.lt.s32.totalorder %s1130_s8, %s1123_s13 }
  0x29   : > { %p1127_p11 = pneg %p1126_p6  ;;  %p1133_p10 = por %p1132_p4, %p1131_p9 }
  0x2b   : > { %p1134_p12 = pnand %p1133_p10, %p1127_p11 }
  0x2d   : > { %1137 = shalt.err (!%p1134_p12)
}
  0x2e   : > { %1031 = dma.hbm_to_vmem [thread:$0]  (!%p1374_p0), %s1368_s18, 128, %s1370_s20, %s251_s28  }
  0x2f   : > { %p1593_p1 = scmp.lt.s32.totalorder %s1252_s26, 3  ;;  %p1594_p2 = scmp.ge.s32.totalorder %s1252_s26, 1 }
  0x31   : > { %p283_p5 = pnand %p1594_p2, %p1593_p1 }
  0x32   : > { %s1410_s30 = sand.u32 (!%p283_p5), 1, %s1236_s22  }
  0x33   : > { %286 = sbr.rel (%p283_p5) target bundleno = 1032 (0x408), region = 40  ;;  %s971_s14 = sshll.u32 (!%p283_p5), %s1410_s30, 3 }
  0x34   : > { %s289_s7 = scalar_lea.sflag (!%p283_p5), [#allocation7], %s1410_s30  ;;  %s292_s15 = scalar_lea.vmem (!%p283_p5), [#allocation6], %s971_s14 }
  0x3a   : > { %1219 = dma.done.wait (%p1346_p8), %s289_s7, 128  }
  0x3b   : > { %1221 = vsyncadd (%p1346_p8), %s289_s7, 4294967168  ;;  %vm368_vm0 = vcmask 261120   ;;  %p343_p9 = scmp.lt.s32.totalorder %s1244_s24, 1  ;;  %v1255_v0 = vmov 0.0   ;;  %vm1256_vm1 = vmmov 0   ;;  %v1257_v1 = vmov 0  }
  0x3c   : > { %998 = vmatprep.subr.bf16.mxu0 %v1255_v0  ;;  %369 = vst.msk [vmem:[#allocation4] sm:$0xff] %vm368_vm0, %v1255_v0  ;;  %370 = vst.msk [vmem:[#allocation5] sm:$0xff] %vm368_vm0, %v1255_v0  ;;  %1000 = vmatprep.mubr.msk.bf16.mxu0 %vm1256_vm1, %v1255_v0  ;;  %s972_s18 = sshll.u32 %s1410_s30, 4  ;;  %v1440_v2 = vld [vmem:[%s292_s15] sm:$0xff]  ;;  %vm365_vm3 = vcmask 57344   ;;  %v1258_v14 = vmov -inf   ;;  %v441_v15 = vlaneseq }
  0x3d   : > { %s1427_s9 = scalar_select %p343_p9, %s1244_s24, 1  ;;  %1096 = vset.pattern.permute.xlu0 %v1257_v1  ;;  %1097 = vset.pattern.permute.xlu1 %v1257_v1  ;;  %v976_v4 = vld [vmem:[%s1580_s0 + $0x1] ss:$0 sm:$0xff]  ;;  %v1449_v5 = vpack.c.bf16 %v1440_v2, %v1440_v2  ;;  %v977_v6 = vld [vmem:[%s1580_s0] ss:$0 sm:$0xff]  ;;  %vm467_vm7 = vcmask 64512  }
  0x3e   : > { %1004 = vmatprep.subr.bf16.mxu1 %v1255_v0  ;;  %1006 = vmatprep.mubr.msk.bf16.mxu1 %vm1256_vm1, %v1255_v0  ;;  %s1451_s7 = scalar_lea.vmem [#allocation9], %s972_s18  ;;  %366 = vst.msk [vmem:[#allocation2] sm:$0x1] %vm365_vm3, %v1258_v14  ;;  %367 = vst.msk [vmem:[#allocation3] sm:$0x1] %vm365_vm3, %v1255_v0  ;;  %v442_v17 = vshrl.u32 %v441_v15, 7 }
  0x3f   : > { %s974_s20 = sshll.u32 %s1427_s9, 3  ;;  %757 = vst.msk [vmem:[%s1451_s7] sm:$0xff] %vm368_vm0, %v1440_v2  ;;  %v398_v9 = vsel %vm368_vm0, %v1449_v5, 0  ;;  %s359_s28 = scalar_lea.vmem %s1584_s4, %s1427_s9  ;;  %vm482_vm8 = vcmask 1043456   ;;  %vm780_vm9 = vcmask 257024  }
  0x40   : > { %s349_s16 = scalar_lea.vmem %s1581_s1, %s974_s20  ;;  %s356_s19 = scalar_lea.vmem %s1583_s3, %s974_s20  ;;  %999 = vmatpush3.bf16.xpose.msra.mxu0 %v398_v9  ;;  %v376_v16 = vld [vmem:[%s359_s28] sm:$0x1]  ;;  %v443_v18 = vsub.s32 0, %v442_v17  ;;  %v483_v47 = vsel %vm482_vm8, %v1449_v5, 0 }
  0x41   : > { %v1442_v3 = vld [vmem:[%s349_s16] sm:$0xff]  ;;  %1016 = vmatprep.subr.bf16.mxu0 %v1255_v0  ;;  %vm447_vm4 = vcmp.gt.f32.partialorder %v376_v16, -5e+08  ;;  %1005 = vmatpush3.bf16.msra.mxu1 %v483_v47  ;;  %s973_s9 = sshll.u32 %s1410_s30, 2  ;;  %s1259_s16 = smov 32  }
  0x42   : > { %v375_v7 = vld [vmem:[%s356_s19] sm:$0xff]  ;;  %v389_v8 = vmul.f32 %v977_v6, %v1442_v3  ;;  %v383_v10 = vmul.f32 %v976_v4, %v1442_v3  ;;  %v448_v19 = vsel %vm447_vm4, 1, %v1257_v1  ;;  %v444_v22 = vrot.slane %v376_v16, %v443_v18  ;;  %1010 = vmatprep.subr.bf16.mxu1 %v1255_v0  ;;  %s342_s13 = scalar_lea.vmem [#allocation10], %s973_s9  ;;  %s986_s17 = sshll.u32 %s1244_s24, 6 }
  0x43   : > { %463 = vperm.xlu1 %1097, %v375_v7   ;;  %vm455_vm2 = vcmp.gt.f32.partialorder %v375_v7, 0.5  ;;  %v452_v21 = vrot.slane %v448_v19, %v443_v18  ;;  %s815_s19 = sshll.u32 %s342_s13, 4  ;;  %s1499_s27 = scalar_lea.hbm %s1586_s6, %s986_s17  ;;  %s816_s19 = int_to_ptr.vmem [resolvable:$true] %s815_s19 }
  0x44   : > { %v391_v11 = vsel %vm368_vm0, %v389_v8, 0.0  ;;  %v384_v12 = vpack.c.bf16 %v383_v10, %v383_v10  ;;  %v456_v13 = vsel %vm455_vm2, 1, %v1257_v1  ;;  %v373_v8 = vpack.c.bf16 %v1442_v3, %v1442_v3  ;;  %s788_s20 = scalar_lea.sflag [#allocation11], %s1410_s30  ;;  %s1138_s15 = scalar_lea.vmem %s816_s19, 64 }
  0x45   : > { %392 = vadd.xlane.f32.xlu0 %v391_v11  ;;  %vm453_vm5 = vcmp.eq.s32.totalorder %v452_v21, 1  ;;  %v526_v39 = vld [vmem:[#allocation2] sm:$0x1]  ;;  %v546_v55 = vld [vmem:[#allocation3] sm:$0x1]  ;;  %p1139_p8 = scmp.ne.s32.totalorder %s816_s19, %s1138_s15  ;;  %p1595_p11 = scmp.ne.s32.totalorder %s1590_s10, 0 }
  0x46   : > { %v619_v9 = vsel %vm482_vm8, %v373_v8, 0  ;;  %s1260_s18 = smov [#allocation10]  }
  0x47   : > { %1001 = vmatmul.mubr.msk.bf16.vlgmr.msra.gmra.mrb[0].mxu0 %vm368_vm0, %v384_v12  ;;  %p1140_p0 = pnand %p1139_p8, %p1595_p11  ;;  %s1142_s28 = sshll.u32 %s1260_s18, 4  ;;  %s1143_s28 = int_to_ptr.vmem [resolvable:$false] %s1142_s28 }
  0x48   : > { %1018 = vmatprep.mubr.msk.bf16.mxu0 %vm1256_vm1, %v1255_v0  ;;  %s1144_s9 = scalar_lea.vmem %s1143_s28, 128  ;;  %p1145_p13 = scmp.lt.s32.totalorder %s816_s19, %s1143_s28 }
  0x49   : > { %p1141_p7 = pneg %p1140_p0  ;;  %p1146_p3 = scmp.lt.s32.totalorder %s1144_s9, %s1138_s15 }
  0x4b   : > { %p1147_p6 = por %p1146_p3, %p1145_p13 }
  0x4d   : > { %p1148_p4 = pnand %p1147_p6, %p1141_p7 }
  0x5b   : > { %458 = vperm.xlu0 %1096, %v456_v13  }
  0xc2   : > { %v464_v30 = vpop.permute.xlu1 %463 }
  0xd2   : > { %v393_v20 = vpop.xlane.xlu0 %392 }
  0xda   : > { %v459_v24 = vpop.permute.xlu0 %458 }
  0xdb   : > { %vm460_vm6 = vcmp.eq.s32.totalorder %v459_v24, 1 }
 0x11a   : > { %v434_v23 = vpop.f32.mrb[0].mxu0 }
 0x11b   : > { %v435_v25 = vadd.f32 %v434_v23, %v393_v20  ;;  %v1002_v26 = vpop.f32.mrb[1].mxu0  ;;  %v592_v20 = vld [vmem:[#allocation4] sm:$0xff] }
 0x11c   : > { %v437_v27 = vpop.f32.mrb[2].mxu0 }
 0x11d   : > { %v446_v28 = vadd.f32 %v444_v22, %v435_v25  ;;  %v1003_v29 = vpop.f32.mrb[3].mxu0 }
 0x11f   : > { %v454_v31 = vsel %vm453_vm5, %v446_v28, -1e+09 }
 0x120   : > { %v466_v32 = vsel %vm460_vm6, %v454_v31, %v464_v30 }
 0x121   : > { %v468_v33 = vsel %vm467_vm7, %v466_v32, -inf }
 0x122   : > { %469 = vmax.xlane.f32.xlu1 %v468_v33  ;;  %v527_v34 = vrot.slane %v468_v33, 4 }
 0x124   : > { %v528_v35 = vmax.f32 %v468_v33, %v527_v34 }
 0x126   : > { %v529_v36 = vrot.slane %v528_v35, 2 }
 0x128   : > { %v530_v37 = vmax.f32 %v528_v35, %v529_v36 }
 0x12a   : > { %v531_v38 = vrot.slane %v530_v37, 1 }
 0x12c   : > { %v532_v40 = vmax.f32 %v530_v37, %v531_v38 }
 0x12e   : > { %v533_v41 = vmax.f32 %v526_v39, %v532_v40 }
 0x130   : > { %v534_v42 = vsub.f32 %v526_v39, %v533_v41  ;;  %v541_v43 = vrot.slane %v533_v41, %v443_v18  ;;  %558 = vst.msk [vmem:[#allocation2] sm:$0x1] %vm365_vm3, %v533_v41 }
 0x132   : > { %v535_v44 = vmul.f32 1.442695, %v534_v42  ;;  %v543_v45 = vsub.f32 %v466_v32, %v541_v43 }
 0x134   : > { %1098 = vpow2.f32 %v535_v44  ;;  %v544_v46 = vmul.f32 1.442695, %v543_v45 }
 0x136   : > { %1100 = vpow2.f32 %v544_v46 }
 0x13e   : > { %v1099_v48 = vpop.eup %1098 }
 0x13f   : > { %559 = vxpose.xlu0.b32.start.end [1/1] (short) (narrow) %v1099_v48, 8  ;;  %v547_v57 = vmul.f32 %v1099_v48, %v546_v55 }
 0x140   : > { %v1101_v49 = vpop.eup %1100 }
 0x141   : > { %v548_v50 = vsel %vm467_vm7, %v1101_v49, 0.0  ;;  %v591_v10 = vpack.c.bf16 %v1101_v49, %v1101_v49 }
 0x142   : > { %v549_v51 = vrot.slane %v548_v50, 4 }
 0x144   : > { %v550_v52 = vadd.f32 %v549_v51, %v548_v50 }
 0x146   : > { %v551_v53 = vrot.slane %v550_v52, 2 }
 0x148   : > { %v552_v54 = vadd.f32 %v551_v53, %v550_v52 }
 0x14a   : > { %v553_v56 = vrot.slane %v552_v54, 1 }
 0x14c   : > { %v554_v58 = vadd.f32 %v553_v56, %v552_v54 }
 0x14e   : > { %v555_v59 = vadd.f32 %v554_v58, %v547_v57 }
 0x150   : > { %557 = vst.msk [vmem:[#allocation3] sm:$0x1] %vm365_vm3, %v555_v59 }
 0x157   : > { %v714_v60 = vld [vmem:[#allocation3] sm:$0x1] }
 0x158   : > { %1102 = vrcp.f32 %v714_v60 }
 0x162   : > { %v1103_v61 = vpop.eup %1102 }
 0x163   : > { %716 = vxpose.xlu0.b32.start.end [1/1] (short) (narrow) %v1103_v61, 8 }
 0x1af   : > { %v470_v62 = vpop.xlane.xlu1 %469 }
 0x1b0   : > { %v471_v63 = vsub.f32 %v466_v32, %v470_v62  ;;  %v663_v32 = vld [vmem:[#allocation5] sm:$0xff] }
 0x1b2   : > { %v472_v1 = vmul.f32 1.442695, %v471_v63 }
 0x1b4   : > { %1104 = vpow2.f32 %v472_v1 }
 0x1be   : > { %v1105_v4 = vpop.eup %1104 }
 0x1bf   : > { %v575_v5 = vpop.trf.xlu0  ;;  %v474_v6 = vsel %vm467_vm7, %v1105_v4, 0.0  ;;  %v478_v7 = vpack.c.bf16 %v1105_v4, %v1105_v4 }
 0x1c0   : > { %475 = vadd.xlane.f32.xlu1 %v474_v6  ;;  %595 = vperm.xlu0 %1096, %v575_v5  }
 0x1c1   : > { %1007 = vmatmul.mubr.msk.bf16.vlgmr.msra.gmra.mrb[0].mxu1 %vm467_vm7, %v478_v7 }
 0x1c2   : > { %1012 = vmatprep.mubr.msk.bf16.mxu1 %vm1256_vm1, %v1255_v0  ;;  %1011 = vmatpush3.bf16.msra.mxu1 %v619_v9 }
 0x1e3   : > { %v732_v11 = vpop.trf.xlu0 }
 0x1ed   : > { %599 = vxpose.xlu1.c.b16.start.end [1/1] (short) (narrow) %v591_v10, 16 }
 0x1f1   : > { %751 = vperm.xlu1 %1097, %v732_v11  }
 0x23f   : > { %v596_v21 = vpop.permute.xlu0 %595 }
 0x240   : > { %v598_v22 = vmul.f32 %v596_v21, %v592_v20  ;;  %v664_v33 = vmul.f32 %v663_v32, %v596_v21 }
 0x24d   : > { %v476_v12 = vpop.xlane.xlu1 %475 }
 0x24e   : > { %1106 = vrcp.f32 %v476_v12 }
 0x253   : > { %v607_v13 = vpop.trf.xlu1 }
 0x254   : > { %1013 = vmatmul.mubr.msk.bf16.vlgmr.msra.gmra.mrb[4].mxu1 %vm467_vm7, %v607_v13 }
 0x258   : > { %v1107_v14 = vpop.eup %1106 }
 0x270   : > { %v752_v28 = vpop.permute.xlu1 %751 }
 0x294   : > { %v519_v15 = vpop.f32.mrb[0].mxu1 }
 0x295   : > { %v525_v16 = vmul.f32 %v1107_v14, %v519_v15  ;;  %v1008_v17 = vpop.f32.mrb[1].mxu1 }
 0x296   : > { %v522_v0 = vpop.f32.mrb[2].mxu1 }
 0x297   : > { %v665_v18 = vpack.c.bf16 %v525_v16, %v525_v16  ;;  %v1009_v3 = vpop.f32.mrb[3].mxu1 }
 0x299   : > { %v667_v19 = vsel %vm482_vm8, %v665_v18, 0 }
 0x29a   : > { %1017 = vmatpush3.bf16.msra.mxu0 %v667_v19 }
 0x29d   : > { %1019 = vmatmul.mubr.msk.bf16.vlgmr.msra.gmra.mrb[4].mxu0 %vm467_vm7, %v607_v13 }
 0x327   : > { %v655_v23 = vpop.f32.mrb[4].mxu1 }
 0x328   : > { %v661_v24 = vadd.f32 %v655_v23, %v598_v22  ;;  %v1014_v25 = vpop.f32.mrb[5].mxu1 }
 0x329   : > { %v658_v26 = vpop.f32.mrb[6].mxu1 }
 0x32a   : > { %662 = vst.msk [vmem:[#allocation4] sm:$0xff] %vm368_vm0, %v661_v24  ;;  %v1015_v27 = vpop.f32.mrb[7].mxu1 }
 0x331   : > { %v748_v29 = vld [vmem:[#allocation4] sm:$0xff] }
 0x332   : > { %v754_v30 = vmul.f32 %v752_v28, %v748_v29 }
 0x334   : > { %759 = vrot.lane.b32.xlu1 %v754_v30, %s1259_s16  ;;  %v779_v31 = vpack.c.bf16 %v754_v30, %v754_v30 }
 0x336   : > { %781 = vst.msk [vmem:[%s342_s13] sm:$0xf] %vm780_vm9, %v779_v31 }
 0x370   : > { %v703_v34 = vpop.f32.mrb[4].mxu0 }
 0x371   : > { %v709_v35 = vadd.f32 %v703_v34, %v664_v33  ;;  %v1020_v36 = vpop.f32.mrb[5].mxu0 }
 0x372   : > { %v706_v37 = vpop.f32.mrb[6].mxu0 }
 0x373   : > { %710 = vst.msk [vmem:[#allocation5] sm:$0xff] %vm368_vm0, %v709_v35  ;;  %v1021_v38 = vpop.f32.mrb[7].mxu0 }
 0x374   : > { %1151 = shalt.err (!%p1148_p4)
}
 0x375   : > { %s1152_s16 = scalar_lea.hbm %s1499_s27, 64  ;;  %s1156_s8 = scalar_lea.hbm %s1586_s6, 128 }
 0x376   : > { %p1153_p10 = scmp.ne.s32.totalorder %s1499_s27, %s1152_s16  ;;  %p1157_p2 = scmp.lt.u32.totalorder %s1499_s27, %s1586_s6 }
 0x377   : > { %p1158_p5 = scmp.lt.u32.totalorder %s1156_s8, %s1152_s16  ;;  %p1160_p8 = scmp.lt.u32.totalorder %s1152_s16, %s1499_s27 }
 0x378   : > { %p1154_p12 = pnand %p1153_p10, %p1595_p11 }
 0x379   : > { %p1159_p9 = por %p1158_p5, %p1157_p2 }
 0x37a   : > { %p1155_p1 = pneg %p1154_p12 }
 0x37b   : > { %p1161_p0 = por %p1160_p8, %p1159_p9 }
 0x37d   : > { %p1162_p7 = pnand %p1161_p0, %p1155_p1 }
 0x37f   : > { %1165 = shalt.err (!%p1162_p7)
}
 0x380   : > { %1025 = dma.vmem_to_hbm [thread:$0]  (%p1595_p11), %s816_s19, 64, %s1499_s27, %s788_s20   ;;  %v755_v39 = vld [vmem:[#allocation5] sm:$0xff]  ;;  %v770_v42 = vmul.f32 %v754_v30, %v1440_v2  ;;  %vm762_vm10 = vcmask 523520   ;;  %vm768_vm11 = vcmask 785920   ;;  %vm775_vm12 = vcmask 1048320  }
 0x381   : > { %v756_v40 = vmul.f32 %v755_v39, %v752_v28  ;;  %s1261_s15 = smov 64   ;;  %s1262_s28 = smov 96  }
 0x382   : > { %s989_s19 = sshll.u32 %s1244_s24, 8  ;;  %s802_s27 = sshll.u32 %s1451_s7, 4  ;;  %s1532_s27 = int_to_ptr.vmem [resolvable:$true] %s802_s27 }
 0x383   : > { %v777_v41 = vmul.f32 %v756_v40, %v1440_v2  ;;  %765 = vrot.lane.b32.xlu1 %v756_v40, %s1261_s15  ;;  %s1530_s16 = scalar_lea.hbm %s1585_s5, %s989_s19  ;;  %s783_s13 = scalar_lea.sflag [#allocation8], %s1410_s30 }
 0x384   : > { %s1166_s17 = scalar_lea.vmem %s1532_s27, 256  ;;  %s1263_s24 = smov [#allocation9]  }
 0x385   : > { %778 = vst.msk [vmem:[%s1451_s7 + $0x8] sm:$0xff] %vm368_vm0, %v777_v41  ;;  %p1167_p13 = scmp.ne.s32.totalorder %s1532_s27, %s1166_s17  ;;  %s1170_s8 = sshll.u32 %s1263_s24, 4  ;;  %s1171_s8 = int_to_ptr.vmem [resolvable:$false] %s1170_s8 }
 0x386   : > { %s1172_s14 = scalar_lea.vmem %s1171_s8, 512  ;;  %p1173_p4 = scmp.lt.s32.totalorder %s1532_s27, %s1171_s8 }
 0x387   : > { %772 = vrot.lane.b32.xlu1 %v770_v42, %s1262_s28  ;;  %p1168_p3 = pnand %p1167_p13, %p1595_p11  ;;  %p1174_p10 = scmp.lt.s32.totalorder %s1172_s14, %s1166_s17 }
 0x389   : > { %p1169_p6 = pneg %p1168_p3  ;;  %p1175_p12 = por %p1174_p10, %p1173_p4 }
 0x38b   : > { %p1176_p1 = pnand %p1175_p12, %p1169_p6 }
 0x3a6   : > { %v760_v43 = vpop.permute.xlu1 %759 }
 0x3a7   : > { %763 = vst.msk [vmem:[%s1451_s7] sm:$0xff] %vm762_vm10, %v760_v43 }
 0x3f5   : > { %v766_v44 = vpop.permute.xlu1 %765 }
 0x3f6   : > { %769 = vst.msk [vmem:[%s1451_s7] sm:$0xff] %vm768_vm11, %v766_v44 }
 0x3f9   : > { %v773_v2 = vpop.permute.xlu1 %772 }
 0x3fa   : > { %776 = vst.msk [vmem:[%s1451_s7] sm:$0xff] %vm775_vm12, %v773_v2 }
 0x3fb   : > { %1179 = shalt.err (!%p1176_p1)
}
 0x3fc   : > { %s1180_s30 = scalar_lea.hbm %s1530_s16, 256  ;;  %s1184_s15 = scalar_lea.hbm %s1585_s5, 512 }
 0x3fd   : > { %p1181_p2 = scmp.ne.s32.totalorder %s1530_s16, %s1180_s30  ;;  %p1185_p8 = scmp.lt.u32.totalorder %s1530_s16, %s1585_s5 }
 0x3fe   : > { %p1186_p0 = scmp.lt.u32.totalorder %s1184_s15, %s1180_s30  ;;  %p1188_p13 = scmp.lt.u32.totalorder %s1180_s30, %s1530_s16 }
 0x3ff   : > { %p1182_p5 = pnand %p1181_p2, %p1595_p11 }
 0x400   : > { %p1187_p7 = por %p1186_p0, %p1185_p8 }
 0x401   : > { %p1183_p9 = pneg %p1182_p5 }
 0x402   : > { %p1189_p3 = por %p1188_p13, %p1187_p7 }
 0x404   : > { %p1190_p6 = pnand %p1189_p3, %p1183_p9 }
 0x406   : > { %1193 = shalt.err (!%p1190_p6)
}
 0x407   : > { %1024 = dma.vmem_to_hbm [thread:$0]  (%p1595_p11), %s1532_s27, 256, %s1530_s16, %s783_s13  }
 0x408 PF: > { %s827_s20 = sand.u32 1, %s1232_s21   ;;  %p1596_p4 = scmp.ne.s32.totalorder %s1591_s12, 0 }
 0x409   : > { %p1597_p10 = scmp.ge.s32.totalorder %s1252_s26, 2  ;;  %s828_s9 = scalar_lea.sflag [#allocation8], %s827_s20 }
 0x40b   : > { %p1033_p12 = pnand %p1597_p10, %p1596_p4 }
 0x40d   : > { %1223 = dma.done.wait (!%p1033_p12), %s828_s9, 256  }
 0x40e   : > { %1225 = vsyncadd (!%p1033_p12), %s828_s9, 4294967040  ;;  %s837_s17 = scalar_lea.sflag [#allocation11], %s827_s20 }
 0x40f   : > { %1227 = dma.done.wait (!%p1033_p12), %s837_s17, 64  }
 0x410   : > { %1229 = vsyncadd (!%p1033_p12), %s837_s17, 4294967232  ;;  %s26_s26 = sadd.s32 1, %s1252_s26   ;;  %s1598_s21 = smov %s1236_s22 }
 0x411   : > { %p23_p1 = scmp.ge.s32.totalorder %s26_s26, 4   ;;  %s1599_s22 = smov %s1240_s23 }
 0x412   : > { %s1600_s23 = smov %s1355_s11  ;;  %s1601_s24 = smov %s1248_s25 }
 0x413   : > { %s1602_s25 = smov %s1604_s29  ;;  %25 = sbr.rel (!%p23_p1) target bundleno = 8 (0x8), region = 119 }
 0x41a   :  { %842 = vsyncpa [#allocation7], 1 }
 0x41b   :  { %844 = vsyncpa [#allocation7 + $0x1], 1 }
 0x41c   :  { %845 = vsyncpa [#allocation8], 1 }
 0x41d   :  { %847 = vsyncpa [#allocation8 + $0x1], 1 }
 0x41e   :  { %848 = vsyncpa [#allocation11], 1 }
 0x41f   :  { %850 = vsyncpa [#allocation11 + $0x1], 1 }

</bundles_post_ra>
